<compile_context>
chip_gen: v5e
topology: v5e:2x2
jax: 0.10.0
libtpu: 0.0.40
codegen_flags: <defaults>
</compile_context>

<pallas_src>
import jax
import jax.numpy as jnp
from jax.experimental import pallas as pl
from jax.experimental.pallas import tpu as pltpu


DEFAULT_TILE_B = 2048     # big tiles amortize per-grid-step overhead


def _round_up(n, m):
    return ((n + m - 1) // m) * m


def _mlp_actor_kernel(x_ref, w1_ref, b1_ref, w2_ref, b2_ref, w3_ref, b3_ref,
                      out_ref):
    # x tile: [TILE_B, D] -> bf16 for the MXU; accumulate in f32.
    x = x_ref[...].astype(jnp.bfloat16)

    # layer1: Linear(D, 64) + ReLU   (f32 bias-add / ReLU; v5e has no bf16 VPU)
    h1 = jnp.dot(x, w1_ref[...], preferred_element_type=jnp.float32)
    h1 = jnp.maximum(h1 + b1_ref[...], 0.0)                      # [TILE_B, 64]

    # layer2: Linear(64, 32) + ReLU
    h2 = jnp.dot(h1.astype(jnp.bfloat16), w2_ref[...],
                 preferred_element_type=jnp.float32)
    h2 = jnp.maximum(h2 + b2_ref[...], 0.0)                      # [TILE_B, 32]

    # actor_logits: Linear(32, A_pad) (no activation; padded cols are zero)
    logits = jnp.dot(h2.astype(jnp.bfloat16), w3_ref[...],
                     preferred_element_type=jnp.float32)
    out_ref[...] = (logits + b3_ref[...]).astype(out_ref.dtype)  # [TILE_B, A_pad]


def swallow_discrete_actor(x, params, *, tile_b=DEFAULT_TILE_B):
    """x: [B, D] float32/bfloat16; params: dict of (w1,b1,w2,b2,w3,b3), W as [in,out]."""
    B, D = x.shape
    A = params["w3"].shape[1]
    # Output writeback dominates HBM traffic here, so pad logit columns only to
    # the next multiple of 8 instead of a 128-lane slab (16x less write for A=4).
    A_pad = _round_up(max(A, 8), 8)

    # Weights in bf16 for the MXU; biases in f32.
    w1 = params["w1"].astype(jnp.bfloat16)
    w2 = params["w2"].astype(jnp.bfloat16)
    b1 = params["b1"].astype(jnp.float32)
    b2 = params["b2"].astype(jnp.float32)
    w3 = jnp.zeros((params["w3"].shape[0], A_pad), jnp.bfloat16)
    w3 = w3.at[:, :A].set(params["w3"].astype(jnp.bfloat16))
    b3 = jnp.zeros((1, A_pad), jnp.float32).at[:, :A].set(
        params["b3"].astype(jnp.float32))

    # Batch tiling: TILE_B multiple of 8; no wrapper-side jnp.pad of x --
    # Pallas masks the ragged tail tile's out-of-bounds writes.
    TILE_B = min(tile_b, _round_up(B, 8))
    if B >= 1024:
        # ensure >= 2 grid steps so v7x's second TensorCore gets work
        TILE_B = min(TILE_B, _round_up(pl.cdiv(B, 2), 8))
    TILE_B = max(8, _round_up(TILE_B, 8))
    grid = (pl.cdiv(B, TILE_B),)

    flops = 2 * B * (D * 64 + 64 * 32 + 32 * A_pad)
    bytes_accessed = (B * D * x.dtype.itemsize + B * A_pad * 4   # x in, logits out
                      + (D * 64 + 64 * 32 + 32 * A_pad) * 2      # bf16 weights
                      + (64 + 32 + A_pad) * 4)                   # f32 biases

    const = lambda i: (0, 0)   # weights/biases: same (resident) block every step
    out = pl.pallas_call(
        _mlp_actor_kernel,
        out_shape=jax.ShapeDtypeStruct((B, A_pad), jnp.float32),
        grid=grid,
        in_specs=[
            pl.BlockSpec((TILE_B, D), lambda i: (i, 0)),     # x: streamed over rows
            pl.BlockSpec((D, 64), const),                    # w1: VMEM-resident
            pl.BlockSpec((1, 64), const),                    # b1
            pl.BlockSpec((64, 32), const),                   # w2
            pl.BlockSpec((1, 32), const),                    # b2
            pl.BlockSpec((32, A_pad), const),                # w3 (padded cols)
            pl.BlockSpec((1, A_pad), const),                 # b3 (padded cols)
        ],
        out_specs=pl.BlockSpec((TILE_B, A_pad), lambda i: (i, 0)),
        compiler_params=pltpu.CompilerParams(
            dimension_semantics=("parallel",),
            vmem_limit_bytes=48 << 20),
        cost_estimate=pl.CostEstimate(
            flops=flops, transcendentals=0, bytes_accessed=bytes_accessed),
    )(x, w1, b1, w2, b2, w3, b3)

    return out[:, :A]


def init_params(key, input_dim, output_dim):
    """Deterministic init mimicking torch.nn.Linear default U(-1/sqrt(fan_in), +)."""
    dims = [(input_dim, 64), (64, 32), (32, output_dim)]
    params = {}
    keys = jax.random.split(key, 2 * len(dims))
    for i, (fan_in, fan_out) in enumerate(dims):
        bound = 1.0 / (fan_in ** 0.5)
        params[f"w{i+1}"] = jax.random.uniform(
            keys[2 * i], (fan_in, fan_out), jnp.float32, -bound, bound)
        # keep bias 2D [1, fan_out] for clean TPU layout / broadcasting
        params[f"b{i+1}"] = jax.random.uniform(
            keys[2 * i + 1], (1, fan_out), jnp.float32, -bound, bound)
    return params


def _reference(x, params):
    """Plain-JAX reference using the same bf16-input / f32-accumulate recipe."""
    w1 = params["w1"].astype(jnp.bfloat16)
    w2 = params["w2"].astype(jnp.bfloat16)
    w3 = params["w3"].astype(jnp.bfloat16)
    h1 = jnp.maximum(
        jnp.dot(x.astype(jnp.bfloat16), w1,
                preferred_element_type=jnp.float32) + params["b1"], 0.0)
    h2 = jnp.maximum(
        jnp.dot(h1.astype(jnp.bfloat16), w2,
                preferred_element_type=jnp.float32) + params["b2"], 0.0)
    return jnp.dot(h2.astype(jnp.bfloat16), w3,
                   preferred_element_type=jnp.float32) + params["b3"]


if __name__ == "__main__":
    key = jax.random.PRNGKey(0)
    k_param, k_x = jax.random.split(key)

    batch = 8
    input_dim = 16    # input_shape[0]
    output_dim = 4    # output_shape (number of discrete actions)

    params = init_params(k_param, input_dim, output_dim)
    x = jax.random.normal(k_x, (batch, input_dim), dtype=jnp.float32)

    logits = swallow_discrete_actor(x, params)
    jax.block_until_ready(logits)

    ref = _reference(x, params)
    assert logits.shape == (batch, output_dim)
    assert jnp.allclose(logits, ref, atol=2e-3, rtol=2e-3), "mismatch vs reference"

    # also sanity check vs full-f32 math (loose tolerance for bf16 matmuls)
    h1 = jnp.maximum(x @ params["w1"] + params["b1"], 0.0)
    h2 = jnp.maximum(h1 @ params["w2"] + params["b2"], 0.0)
    ref_f32 = h2 @ params["w3"] + params["b3"]
    assert jnp.allclose(logits, ref_f32, atol=5e-2, rtol=5e-2), "mismatch vs f32 reference"

    print("KERNEL_OK")
</pallas_src>

<mosaic_0001>
module attributes {stable_mosaic.version = 11 : i64} {
  func.func @_mlp_actor_kernel(%arg0: i32, %arg1: memref<8x16xf32, #tpu.memory_space<vmem>>, %arg2: memref<16x64xbf16, #tpu.memory_space<vmem>>, %arg3: memref<1x64xf32, #tpu.memory_space<vmem>>, %arg4: memref<64x32xbf16, #tpu.memory_space<vmem>>, %arg5: memref<1x32xf32, #tpu.memory_space<vmem>>, %arg6: memref<32x8xbf16, #tpu.memory_space<vmem>>, %arg7: memref<1x8xf32, #tpu.memory_space<vmem>>, %arg8: memref<8x8xf32, #tpu.memory_space<vmem>>) attributes {dimension_semantics = [#tpu.dimension_semantics<parallel>], iteration_bounds = array<i64: 1>, scalar_prefetch = 0 : i64, scratch_operands = 0 : i64, tpu.core_type = #tpu.core_type<tc>, window_params = [{transform_indices = @transform_0, window_bounds = array<i64: 8, 16>}, {pipeline_mode = #tpu.pipeline_mode<synchronous>, transform_indices = @transform_1, window_bounds = array<i64: 16, 64>}, {pipeline_mode = #tpu.pipeline_mode<synchronous>, transform_indices = @transform_2, window_bounds = array<i64: 1, 64>}, {pipeline_mode = #tpu.pipeline_mode<synchronous>, transform_indices = @transform_3, window_bounds = array<i64: 64, 32>}, {pipeline_mode = #tpu.pipeline_mode<synchronous>, transform_indices = @transform_4, window_bounds = array<i64: 1, 32>}, {pipeline_mode = #tpu.pipeline_mode<synchronous>, transform_indices = @transform_5, window_bounds = array<i64: 32, 8>}, {pipeline_mode = #tpu.pipeline_mode<synchronous>, transform_indices = @transform_6, window_bounds = array<i64: 1, 8>}, {transform_indices = @transform_7, window_bounds = array<i64: 8, 8>}]} {
    %c0 = arith.constant 0 : index
    %c0_0 = arith.constant 0 : index
    %0 = vector.load %arg1[%c0, %c0_0] : memref<8x16xf32, #tpu.memory_space<vmem>>, vector<8x16xf32>
    %1 = arith.truncf %0 : vector<8x16xf32> to vector<8x16xbf16>
    %c0_1 = arith.constant 0 : index
    %c0_2 = arith.constant 0 : index
    %2 = vector.load %arg2[%c0_1, %c0_2] : memref<16x64xbf16, #tpu.memory_space<vmem>>, vector<16x64xbf16>
    %cst = arith.constant dense<0.000000e+00> : vector<8x64xf32>
    %3 = tpu.matmul %1, %2, %cst {dimension_numbers = #tpu.dot_dimension_numbers<[1], [0], [0], [1], [0, 0, 1, 1], [], []>} : vector<8x16xbf16>, vector<16x64xbf16>, vector<8x64xf32> -> vector<8x64xf32>
    %c0_3 = arith.constant 0 : index
    %c0_4 = arith.constant 0 : index
    %4 = vector.load %arg3[%c0_3, %c0_4] : memref<1x64xf32, #tpu.memory_space<vmem>>, vector<1x64xf32>
    %5 = vector.broadcast %4 : vector<1x64xf32> to vector<8x64xf32>
    %6 = arith.addf %3, %5 : vector<8x64xf32>
    %cst_5 = arith.constant 0.000000e+00 : f32
    %7 = vector.broadcast %cst_5 : f32 to vector<8x64xf32>
    %8 = arith.maximumf %6, %7 : vector<8x64xf32>
    %9 = arith.truncf %8 : vector<8x64xf32> to vector<8x64xbf16>
    %c0_6 = arith.constant 0 : index
    %c0_7 = arith.constant 0 : index
    %10 = vector.load %arg4[%c0_6, %c0_7] : memref<64x32xbf16, #tpu.memory_space<vmem>>, vector<64x32xbf16>
    %cst_8 = arith.constant dense<0.000000e+00> : vector<8x32xf32>
    %11 = tpu.matmul %9, %10, %cst_8 {dimension_numbers = #tpu.dot_dimension_numbers<[1], [0], [0], [1], [0, 0, 1, 1], [], []>} : vector<8x64xbf16>, vector<64x32xbf16>, vector<8x32xf32> -> vector<8x32xf32>
    %c0_9 = arith.constant 0 : index
    %c0_10 = arith.constant 0 : index
    %12 = vector.load %arg5[%c0_9, %c0_10] : memref<1x32xf32, #tpu.memory_space<vmem>>, vector<1x32xf32>
    %13 = vector.broadcast %12 : vector<1x32xf32> to vector<8x32xf32>
    %14 = arith.addf %11, %13 : vector<8x32xf32>
    %cst_11 = arith.constant 0.000000e+00 : f32
    %15 = vector.broadcast %cst_11 : f32 to vector<8x32xf32>
    %16 = arith.maximumf %14, %15 : vector<8x32xf32>
    %17 = arith.truncf %16 : vector<8x32xf32> to vector<8x32xbf16>
    %c0_12 = arith.constant 0 : index
    %c0_13 = arith.constant 0 : index
    %18 = vector.load %arg6[%c0_12, %c0_13] : memref<32x8xbf16, #tpu.memory_space<vmem>>, vector<32x8xbf16>
    %cst_14 = arith.constant dense<0.000000e+00> : vector<8x8xf32>
    %19 = tpu.matmul %17, %18, %cst_14 {dimension_numbers = #tpu.dot_dimension_numbers<[1], [0], [0], [1], [0, 0, 1, 1], [], []>} : vector<8x32xbf16>, vector<32x8xbf16>, vector<8x8xf32> -> vector<8x8xf32>
    %c0_15 = arith.constant 0 : index
    %c0_16 = arith.constant 0 : index
    %20 = vector.load %arg7[%c0_15, %c0_16] : memref<1x8xf32, #tpu.memory_space<vmem>>, vector<1x8xf32>
    %21 = vector.broadcast %20 : vector<1x8xf32> to vector<8x8xf32>
    %22 = arith.addf %19, %21 : vector<8x8xf32>
    %c0_17 = arith.constant 0 : index
    %c0_18 = arith.constant 0 : index
    %23 = vector.load %arg8[%c0_17, %c0_18] : memref<8x8xf32, #tpu.memory_space<vmem>>, vector<8x8xf32>
    tpu.vector_store %arg8[%c0_17, %c0_18], %22 {strides = array<i32>} : memref<8x8xf32, #tpu.memory_space<vmem>>, vector<8x8xf32>,
    return
  }
  func.func @transform_0(%arg0: i32) -> (i32, i32) {
    %c0_i32 = arith.constant 0 : i32
    %c0_i32_0 = arith.constant 0 : i32
    return %arg0, %c0_i32 : i32, i32
  }
  func.func @transform_1(%arg0: i32) -> (i32, i32) {
    %c0_i32 = arith.constant 0 : i32
    %c0_i32_0 = arith.constant 0 : i32
    %c0_i32_1 = arith.constant 0 : i32
    return %c0_i32, %c0_i32_0 : i32, i32
  }
  func.func @transform_2(%arg0: i32) -> (i32, i32) {
    %c0_i32 = arith.constant 0 : i32
    %c0_i32_0 = arith.constant 0 : i32
    %c0_i32_1 = arith.constant 0 : i32
    return %c0_i32, %c0_i32_0 : i32, i32
  }
  func.func @transform_3(%arg0: i32) -> (i32, i32) {
    %c0_i32 = arith.constant 0 : i32
    %c0_i32_0 = arith.constant 0 : i32
    %c0_i32_1 = arith.constant 0 : i32
    return %c0_i32, %c0_i32_0 : i32, i32
  }
  func.func @transform_4(%arg0: i32) -> (i32, i32) {
    %c0_i32 = arith.constant 0 : i32
    %c0_i32_0 = arith.constant 0 : i32
    %c0_i32_1 = arith.constant 0 : i32
    return %c0_i32, %c0_i32_0 : i32, i32
  }
  func.func @transform_5(%arg0: i32) -> (i32, i32) {
    %c0_i32 = arith.constant 0 : i32
    %c0_i32_0 = arith.constant 0 : i32
    %c0_i32_1 = arith.constant 0 : i32
    return %c0_i32, %c0_i32_0 : i32, i32
  }
  func.func @transform_6(%arg0: i32) -> (i32, i32) {
    %c0_i32 = arith.constant 0 : i32
    %c0_i32_0 = arith.constant 0 : i32
    %c0_i32_1 = arith.constant 0 : i32
    return %c0_i32, %c0_i32_0 : i32, i32
  }
  func.func @transform_7(%arg0: i32) -> (i32, i32) {
    %c0_i32 = arith.constant 0 : i32
    %c0_i32_0 = arith.constant 0 : i32
    return %arg0, %c0_i32 : i32, i32
  }
}

</mosaic_0001>

<bundles_post_ra>
// kernel: tpu_custom_call.1
= control target key start
LH: loop header
LB: loop body
LE: loop exit
PB: predicated region body
PF: predicated region fallthrough
CT: control target
= control target key end

     0   :  { %vm42_vm0 = vcmask 130048   ;;  %s316_s0 = inlined_call_operand.vmem [shape: f32[8,16], index: 0, kind: input, shape index: {}]   ;;  %s317_s1 = inlined_call_operand.vmem [shape: bf16[16,64], index: 1, kind: input, shape index: {}]   ;;  %s318_s2 = inlined_call_operand.vmem [shape: f32[1,64], index: 2, kind: input, shape index: {}]   ;;  %s319_s3 = inlined_call_operand.vmem [shape: bf16[64,32], index: 3, kind: input, shape index: {}]   ;;  %s320_s4 = inlined_call_operand.vmem [shape: f32[1,32], index: 4, kind: input, shape index: {}]   ;;  %s321_s5 = inlined_call_operand.vmem [shape: bf16[32,8], index: 5, kind: input, shape index: {}]   ;;  %s322_s6 = inlined_call_operand.vmem [shape: f32[1,8], index: 6, kind: input, shape index: {}]   ;;  %s323_s7 = inlined_call_operand.hbm [shape: f32[8,8], index: 7, kind: output, shape index: {}]  }
   0x1   :  { %v202_v0 = vld [vmem:[%s317_s1] sm:$0xff]  ;;  %v206_v2 = vld [vmem:[%s319_s3 + $0x18] sm:$0xff]  ;;  %v205_v4 = vld [vmem:[%s319_s3 + $0x10] sm:$0xff] }
   0x2   :  { %v28_v1 = vld [vmem:[%s316_s0] sm:$0xff]  ;;  %53 = vmatpush.bf16.msra.mxu0 %v202_v0  ;;  %105 = vmatpush.bf16.msra.mxu1 %v206_v2 }
   0x3   :  { %v29_v3 = vpack.c.bf16 %v28_v1, %v28_v1 }
   0x4   :  { %12 = vsyncpa [#allocation3], 0  ;;  %v204_v5 = vld [vmem:[%s319_s3 + $0x8] sm:$0xff]  ;;  %v203_v6 = vld [vmem:[%s319_s3] sm:$0xff]  ;;  %vm97_vm1 = vcmask 523264   ;;  %vm136_vm2 = vcmask 261120  }
   0x5   :  { %175 = vmatmul.msk.bf16.vlgmr.msra.gmra.mxu0 %vm42_vm0, %v29_v3  ;;  %v210_v7 = vld [vmem:[%s318_s2] ss:$0 sm:$0xff]  ;;  %v208_v13 = vld [vmem:[%s321_s5 + $0x8] sm:$0xff]  ;;  %s239_s19 = smov [#allocation2]   ;;  %s162_s22 = sshll.u32 %s323_s7, 4  ;;  %vm153_vm3 = vcmask 64512   ;;  %s163_s22 = int_to_ptr.hbm [resolvable:$true] %s162_s22 }
   0x6   :  { %106 = vmatpush.bf16.msra.mxu1 %v205_v4  ;;  %146 = vmatpush.bf16.msra.mxu2 %v208_v13  ;;  %v207_v14 = vld [vmem:[%s321_s5] sm:$0xff]  ;;  %s160_s20 = sshll.u32 %s239_s19, 4  ;;  %s161_s20 = int_to_ptr.vmem [resolvable:$true] %s160_s20 }
   0x7   :  { %v211_v15 = vld [vmem:[%s320_s4] ss:$0 sm:$0xff] }
   0x8   :  { %v212_v21 = vld [vmem:[%s322_s6] ss:$0 sm:$0xff] }
   0xa   :  { %107 = vmatpush.bf16.msra.mxu1 %v204_v5  ;;  %147 = vmatpush.bf16.msra.mxu2 %v207_v14 }
   0xe   :  { %108 = vmatpush.bf16.msra.mxu1 %v203_v6 }
  0x82   :  { %v55_v8 = vpop.f32.mrf.mxu0 }
  0x83   :  { %v56_v9 = vadd.f32 %v210_v7, %v55_v8 }
  0x85   :  { %v59_v10 = vmax.f32 %v56_v9, 0.0 }
  0x87   :  { %v60_v11 = vpack.c.bf16 %v59_v10, %v59_v10 }
  0x89   :  { %192 = vmatmul.msk.bf16.vlgmr.msra.gmra.mxu1 %vm97_vm1, %v60_v11 }
  0x8a   :  { %v57_v12 = vpop.f32.mrf.mxu0 }
 0x106   :  { %v110_v16 = vpop.f32.mrf.mxu1 }
 0x107   :  { %v111_v17 = vadd.f32 %v211_v15, %v110_v16 }
 0x109   :  { %v114_v18 = vmax.f32 %v111_v17, 0.0 }
 0x10b   :  { %v115_v19 = vpack.c.bf16 %v114_v18, %v114_v18 }
 0x10d   :  { %201 = vmatmul.msk.bf16.vlgmr.msra.gmra.mxu2 %vm136_vm2, %v115_v19 }
 0x10e   :  { %v112_v20 = vpop.f32.mrf.mxu1 }
 0x190   :  { %v149_v22 = vpop.f32.mrf.mxu2 }
 0x191   :  { %v150_v23 = vadd.f32 %v212_v21, %v149_v22 }
 0x193   :  { %154 = vst.msk [vmem:[#allocation2] sm:$0xff] %vm153_vm3, %v150_v23 }
 0x194   :  { %165 = dma.vmem_to_hbm [thread:$0]  %s161_s20, 128, %s163_s22, [#allocation3]  }
 0x198   :  { %v151_v24 = vpop.f32.mrf.mxu2 }
 0x199   :  { %237 = dma.done.wait [#allocation3], 128  }
 0x19a   :  { %238 = vsyncadd [#allocation3], 4294967168 }
 0x19b   :  { %170 = vsyncpa [#allocation3], 1 }

</bundles_post_ra>
